<compile_context>
chip_gen: v7x
topology: tpu7x:2x2x1
jax: 0.10.0
libtpu: 0.0.40
codegen_flags: <defaults>
</compile_context>

<pallas_src>
import math

import jax
import jax.numpy as jnp
from jax.experimental import pallas as pl
from jax.experimental.pallas import tpu as pltpu


def find_multiple(n: int, k: int) -> int:
    if n % k == 0:
        return n
    return n + k - n % k


def _vmem_capacity_bytes() -> int:
    """Physical VMEM per TensorCore (64 MiB on v7x, 128 MiB on v5e/v6e)."""
    try:
        return int(pltpu.get_tpu_info().vmem_capacity_bytes)
    except Exception:
        return 64 << 20  # conservative fallback, valid on every generation


def _largest_dividing_tile(H: int, target: int, step: int = 128) -> int:
    """Largest multiple of `step` that divides H and is <= target (else H)."""
    best = None
    t = step
    while t <= min(H, target):
        if H % t == 0:
            best = t
        t += step
    return best if best is not None else H


# ----------------------------------------------------------------------------
# Tile selection (one-time, before weight preparation)
# ----------------------------------------------------------------------------
def choose_th(M, D, H, *, out_itemsize=4, tm_target=512):
    """Pick the hidden-dim tile th (divides H) for the current hardware."""
    vmem_cap = _vmem_capacity_bytes()
    cap = int(vmem_cap * 0.8)

    tm = tm_target if M >= tm_target else find_multiple(max(M, 1), 16)
    act_bytes = (2 * tm * D * 2) + (2 * tm * D * out_itemsize) + (tm * D * 4)

    # (1) Weights-resident fast path: all fused weights (counted with 2 buffers)
    #     fit comfortably -> single H step, weights DMA'd once, no restream.
    resident_bytes = 2 * (3 * D * H * 2)  # bf16
    if resident_bytes + act_bytes <= min(cap, int(vmem_cap * 0.6)):
        return H

    # (2) Streamed path: deep K for the down-projection.  256 matches the
    #     256-deep v6e/v7x MXU; 512 on the 128-MiB-VMEM chips halves the
    #     accumulator RMW passes again.
    th_target = 512 if vmem_cap >= (96 << 20) else 256
    th = _largest_dividing_tile(H, th_target)
    while th > 128:
        slice_bytes = 2 * (D * 2 * th) * 2 + 2 * (th * D) * 2
        if slice_bytes + act_bytes <= cap:
            break
        smaller = _largest_dividing_tile(H, th - 128)
        if smaller >= th:
            break
        th = smaller
    return th


# ----------------------------------------------------------------------------
# Kernel body
# ----------------------------------------------------------------------------
def _mlp_kernel(x_ref, w12_ref, w3_ref, o_ref, acc_ref):
    """One (M-tile, H-tile) grid step of the SwiGLU MLP.

    x_ref   : (tm, D)      bf16 activation tile (same tile across the H axis)
    w12_ref : (D, 2*th)    bf16 fused [W1 | W2] H-slice  (gate | up)
    w3_ref  : (th, D)      bf16 W3^T H-slice
    o_ref   : (tm, D)      output tile (written on the last H step)
    acc_ref : (tm, D) f32  VMEM accumulator for the down projection
    """
    th = w3_ref.shape[0]
    j = pl.program_id(1)

    @pl.when(j == 0)
    def _():
        acc_ref[...] = jnp.zeros_like(acc_ref)

    x = x_ref[...]  # (tm, D) bf16
    # Fused gate/up projection: one MXU matmul, f32 accumulation.
    h = jnp.dot(x, w12_ref[...], preferred_element_type=jnp.float32)  # (tm, 2*th)
    h1 = h[:, :th]
    h2 = h[:, th:]

    # SiLU gating in f32 (sigmoid on the EUP, mul on the VPU).
    g = (h1 * jax.nn.sigmoid(h1)) * h2

    # Partial down projection for this H slice, accumulated in f32.
    acc_ref[...] += jnp.dot(
        g.astype(w3_ref.dtype), w3_ref[...], preferred_element_type=jnp.float32
    )

    @pl.when(j == pl.num_programs(1) - 1)
    def _():
        o_ref[...] = acc_ref[...].astype(o_ref.dtype)


# ----------------------------------------------------------------------------
# One-time parameter preparation (do this at load time, not per forward call)
# ----------------------------------------------------------------------------
def prepare_mlp_params(w1, w2, w3, *, th, dtype=jnp.bfloat16):
    """w1, w2: (H, D), w3: (D, H) in PyTorch nn.Linear (out, in) layout.

    Returns:
      w12 : (D, 2*H) bf16, laid out so columns [j*2*th : (j+1)*2*th] hold
            [W1^T tile j | W2^T tile j]  (one lane-dense fused gate/up block).
      w3t : (H, D) bf16  (W3 transposed so the down-proj is lane-dense).
    """
    H, D = w1.shape
    assert w2.shape == (H, D) and w3.shape == (D, H)
    assert H % th == 0, "hidden size must be a multiple of the H tile"
    n_th = H // th

    w1t = w1.T.astype(dtype)  # (D, H)
    w2t = w2.T.astype(dtype)  # (D, H)
    w12 = jnp.concatenate(
        [w1t.reshape(D, n_th, th), w2t.reshape(D, n_th, th)], axis=-1
    ).reshape(D, 2 * H)
    w3t = w3.T.astype(dtype)  # (H, D)
    return w12, w3t


# ----------------------------------------------------------------------------
# Forward wrapper
# ----------------------------------------------------------------------------
def mlp_forward(x, w12, w3t, th, *, tm=None, out_dtype=None):
    """x: (B, T, D).  w12: (D, 2H) fused bf16, w3t: (H, D) bf16 (pre-prepared)."""
    B, T, D = x.shape
    H, D2 = w3t.shape
    assert D2 == D and w12.shape == (D, 2 * H) and H % th == 0

    out_dtype = x.dtype if out_dtype is None else jnp.dtype(out_dtype)
    out_itemsize = jnp.dtype(out_dtype).itemsize

    M = B * T
    n_th = H // th

    # --- M tiling.  Big tiles for prefill (AI ~ tm FLOP / streamed weight
    # byte); 16-row-aligned clamp for small / decode M.
    if tm is None:
        tm = 512
    if M < tm:
        tm = find_multiple(M, 16)
    # 2-TC (v7x) decode: with a single M tile the second TensorCore idles.
    # When weights are VMEM-resident (n_th == 1) splitting costs nothing
    # (constant weight block index -> no restream), so force two M tiles.
    if n_th == 1 and M >= 32 and find_multiple(M, tm) // tm == 1:
        tm = find_multiple((M + 1) // 2, 16)

    M_pad = find_multiple(M, tm)

    x2d = x.reshape(M, D).astype(w12.dtype)
    if M_pad != M:
        x2d = jnp.pad(x2d, ((0, M_pad - M), (0, 0)))

    grid = (M_pad // tm, n_th)

    # --- VMEM budget: actual tile footprint + headroom, clamped to hardware
    # capacity (never request more than ~80% of physical VMEM; no 32 MiB floor).
    vmem_cap = _vmem_capacity_bytes()
    w_item = jnp.dtype(w12.dtype).itemsize
    vmem_bytes = (
        2 * (D * 2 * th) * w_item          # fused W1|W2 slice, double-buffered
        + 2 * (th * D) * w_item            # W3^T slice, double-buffered
        + 2 * (tm * D) * x2d.dtype.itemsize  # x tile, double-buffered
        + 2 * (tm * D) * out_itemsize      # out tile, double-buffered
        + (tm * D) * 4                     # f32 accumulator scratch
    )
    vmem_bytes = int(vmem_bytes * 1.25) + (2 << 20)
    vmem_bytes = max(16 << 20, vmem_bytes)
    vmem_bytes = min(vmem_bytes, int(vmem_cap * 0.8))

    # Advisory cost estimate so XLA schedules neighbouring ops sensibly.
    n_m_tiles = M_pad // tm
    weight_bytes = 3 * D * H * w_item * (n_m_tiles if n_th > 1 else 1)
    cost = pl.CostEstimate(
        flops=6 * M_pad * D * H,
        transcendentals=M_pad * H,
        bytes_accessed=(
            M_pad * D * x2d.dtype.itemsize + M_pad * D * out_itemsize + weight_bytes
        ),
    )

    out = pl.pallas_call(
        _mlp_kernel,
        out_shape=jax.ShapeDtypeStruct((M_pad, D), out_dtype),
        grid_spec=pltpu.PrefetchScalarGridSpec(
            num_scalar_prefetch=0,
            grid=grid,
            in_specs=[
                pl.BlockSpec((tm, D), lambda i, j: (i, 0)),        # x tile
                pl.BlockSpec((D, 2 * th), lambda i, j: (0, j)),    # fused W1|W2 slice
                pl.BlockSpec((th, D), lambda i, j: (j, 0)),        # W3^T slice
            ],
            out_specs=pl.BlockSpec((tm, D), lambda i, j: (i, 0)),  # lane-dense output
            scratch_shapes=[pltpu.VMEM((tm, D), jnp.float32)],
        ),
        compiler_params=pltpu.CompilerParams(
            dimension_semantics=("parallel", "arbitrary"),
            vmem_limit_bytes=int(vmem_bytes),
        ),
        cost_estimate=cost,
    )(x2d, w12, w3t)

    return out[:M].reshape(B, T, D)


# ----------------------------------------------------------------------------
# Reference (mirrors the bf16-compute / f32-accumulate recipe of the kernel)
# ----------------------------------------------------------------------------
def mlp_reference(x, w1, w2, w3, compute_dtype=jnp.bfloat16):
    B, T, D = x.shape
    xb = x.reshape(-1, D).astype(compute_dtype)
    h1 = jnp.dot(xb, w1.T.astype(compute_dtype), preferred_element_type=jnp.float32)
    h2 = jnp.dot(xb, w2.T.astype(compute_dtype), preferred_element_type=jnp.float32)
    g = (jax.nn.silu(h1) * h2).astype(compute_dtype)
    y = jnp.dot(g, w3.T.astype(compute_dtype), preferred_element_type=jnp.float32)
    return y.astype(x.dtype).reshape(B, T, D)


if __name__ == "__main__":
    # Small synthetic LLaMA config: n_embd=128, multiple_of=128
    #   hidden_dim = 4 * 128 = 512
    #   n_hidden   = find_multiple(int(2 * 512 / 3), 128) = 384
    n_embd = 128
    multiple_of = 128
    hidden_dim = 4 * n_embd
    n_hidden = find_multiple(int(2 * hidden_dim / 3), multiple_of)

    B, T = 2, 8

    key = jax.random.PRNGKey(0)
    kx, k1, k2, k3 = jax.random.split(key, 4)
    x = jax.random.normal(kx, (B, T, n_embd), dtype=jnp.float32)
    # nn.Linear(in, out, bias=False) -> weight shape (out, in)
    w1 = jax.random.normal(k1, (n_hidden, n_embd), dtype=jnp.float32) / math.sqrt(n_embd)
    w2 = jax.random.normal(k2, (n_hidden, n_embd), dtype=jnp.float32) / math.sqrt(n_embd)
    w3 = jax.random.normal(k3, (n_embd, n_hidden), dtype=jnp.float32) / math.sqrt(n_hidden)

    # One-time tile selection + parameter prep (transpose, gate/up fusion, bf16).
    # For this tiny config the weights-resident path triggers (th = n_hidden).
    th = choose_th(B * T, n_embd, n_hidden,
                   out_itemsize=jnp.dtype(x.dtype).itemsize)
    w12, w3t = prepare_mlp_params(w1, w2, w3, th=th)

    # TODO(synk): LoRA variant (config.add_mlp_lora=True) not implemented; this
    # kernel covers the default dense path of MLP.forward.
    y = mlp_forward(x, w12, w3t, th)
    jax.block_until_ready(y)

    y_ref = mlp_reference(x, w1, w2, w3)
    assert y.shape == (B, T, n_embd)
    assert jnp.allclose(y, y_ref, atol=2e-2, rtol=2e-2), (
        "mismatch vs reference, max abs diff = "
        + str(float(jnp.max(jnp.abs(y - y_ref))))
    )

    print("KERNEL_OK")
</pallas_src>

<mosaic_0001>
module attributes {stable_mosaic.version = 11 : i64} {
  func.func @_mlp_kernel(%arg0: i32, %arg1: i32, %arg2: memref<16x128xbf16, #tpu.memory_space<vmem>>, %arg3: memref<128x768xbf16, #tpu.memory_space<vmem>>, %arg4: memref<384x128xbf16, #tpu.memory_space<vmem>>, %arg5: memref<16x128xf32, #tpu.memory_space<vmem>>, %arg6: memref<16x128xf32, #tpu.memory_space<vmem>>) attributes {dimension_semantics = [#tpu.dimension_semantics<parallel>, #tpu.dimension_semantics<arbitrary>], iteration_bounds = array<i64: 1, 1>, scalar_prefetch = 0 : i64, scratch_operands = 1 : i64, tpu.core_type = #tpu.core_type<tc>, window_params = [{transform_indices = @transform_0, window_bounds = array<i64: 16, 128>}, {transform_indices = @transform_1, window_bounds = array<i64: 128, 768>}, {transform_indices = @transform_2, window_bounds = array<i64: 384, 128>}, {transform_indices = @transform_3, window_bounds = array<i64: 16, 128>}]} {
    %c0_i32 = arith.constant 0 : i32
    %0 = arith.cmpi eq, %arg1, %c0_i32 : i32
    %1 = arith.extui %0 : i1 to i32
    %c0_i32_0 = arith.constant 0 : i32
    %2 = arith.cmpi ne, %1, %c0_i32_0 : i32
    scf.if %2 {
      %cst_14 = arith.constant 0.000000e+00 : f32
      %24 = vector.broadcast %cst_14 : f32 to vector<16x128xf32>
      %c0_15 = arith.constant 0 : index
      %c0_16 = arith.constant 0 : index
      %25 = vector.load %arg6[%c0_15, %c0_16] : memref<16x128xf32, #tpu.memory_space<vmem>>, vector<16x128xf32>
      tpu.vector_store %arg6[%c0_15, %c0_16], %24 {strides = array<i32>} : memref<16x128xf32, #tpu.memory_space<vmem>>, vector<16x128xf32>,
    } else {
    }
    %c0 = arith.constant 0 : index
    %c0_1 = arith.constant 0 : index
    %3 = vector.load %arg2[%c0, %c0_1] : memref<16x128xbf16, #tpu.memory_space<vmem>>, vector<16x128xbf16>
    %c0_2 = arith.constant 0 : index
    %c0_3 = arith.constant 0 : index
    %4 = vector.load %arg3[%c0_2, %c0_3] : memref<128x768xbf16, #tpu.memory_space<vmem>>, vector<128x768xbf16>
    %cst = arith.constant dense<0.000000e+00> : vector<16x768xf32>
    %5 = tpu.matmul %3, %4, %cst {dimension_numbers = #tpu.dot_dimension_numbers<[1], [0], [0], [1], [0, 0, 1, 1], [], []>} : vector<16x128xbf16>, vector<128x768xbf16>, vector<16x768xf32> -> vector<16x768xf32>
    %6 = vector.extract_strided_slice %5 {offsets = [0, 0], sizes = [16, 384], strides = [1, 1]} : vector<16x768xf32> to vector<16x384xf32>
    %7 = vector.extract_strided_slice %5 {offsets = [0, 384], sizes = [16, 384], strides = [1, 1]} : vector<16x768xf32> to vector<16x384xf32>
    %8 = arith.negf %6 : vector<16x384xf32>
    %9 = math.exp %8 : vector<16x384xf32>
    %cst_4 = arith.constant 1.000000e+00 : f32
    %10 = vector.broadcast %cst_4 : f32 to vector<16x384xf32>
    %11 = arith.addf %10, %9 : vector<16x384xf32>
    %12 = arith.divf %10, %11 : vector<16x384xf32>
    %13 = arith.mulf %6, %12 : vector<16x384xf32>
    %14 = arith.mulf %13, %7 : vector<16x384xf32>
    %c0_5 = arith.constant 0 : index
    %c0_6 = arith.constant 0 : index
    %15 = vector.load %arg6[%c0_5, %c0_6] : memref<16x128xf32, #tpu.memory_space<vmem>>, vector<16x128xf32>
    %16 = arith.truncf %14 : vector<16x384xf32> to vector<16x384xbf16>
    %c0_7 = arith.constant 0 : index
    %c0_8 = arith.constant 0 : index
    %17 = vector.load %arg4[%c0_7, %c0_8] : memref<384x128xbf16, #tpu.memory_space<vmem>>, vector<384x128xbf16>
    %cst_9 = arith.constant dense<0.000000e+00> : vector<16x128xf32>
    %18 = tpu.matmul %16, %17, %cst_9 {dimension_numbers = #tpu.dot_dimension_numbers<[1], [0], [0], [1], [0, 0, 1, 1], [], []>} : vector<16x384xbf16>, vector<384x128xbf16>, vector<16x128xf32> -> vector<16x128xf32>
    %19 = arith.addf %15, %18 : vector<16x128xf32>
    %c0_10 = arith.constant 0 : index
    %c0_11 = arith.constant 0 : index
    %20 = vector.load %arg6[%c0_10, %c0_11] : memref<16x128xf32, #tpu.memory_space<vmem>>, vector<16x128xf32>
    tpu.vector_store %arg6[%c0_10, %c0_11], %19 {strides = array<i32>} : memref<16x128xf32, #tpu.memory_space<vmem>>, vector<16x128xf32>,
    %c0_i32_12 = arith.constant 0 : i32
    %21 = arith.cmpi eq, %arg1, %c0_i32_12 : i32
    %22 = arith.extui %21 : i1 to i32
    %c0_i32_13 = arith.constant 0 : i32
    %23 = arith.cmpi ne, %22, %c0_i32_13 : i32
    scf.if %23 {
      %c0_14 = arith.constant 0 : index
      %c0_15 = arith.constant 0 : index
      %24 = vector.load %arg6[%c0_14, %c0_15] : memref<16x128xf32, #tpu.memory_space<vmem>>, vector<16x128xf32>
      %c0_16 = arith.constant 0 : index
      %c0_17 = arith.constant 0 : index
      %25 = vector.load %arg5[%c0_16, %c0_17] : memref<16x128xf32, #tpu.memory_space<vmem>>, vector<16x128xf32>
      tpu.vector_store %arg5[%c0_16, %c0_17], %24 {strides = array<i32>} : memref<16x128xf32, #tpu.memory_space<vmem>>, vector<16x128xf32>,
    } else {
    }
    return
  }
  func.func @transform_0(%arg0: i32, %arg1: i32) -> (i32, i32) {
    %c0_i32 = arith.constant 0 : i32
    %c0_i32_0 = arith.constant 0 : i32
    return %arg0, %c0_i32 : i32, i32
  }
  func.func @transform_1(%arg0: i32, %arg1: i32) -> (i32, i32) {
    %c0_i32 = arith.constant 0 : i32
    %c0_i32_0 = arith.constant 0 : i32
    return %c0_i32, %arg1 : i32, i32
  }
  func.func @transform_2(%arg0: i32, %arg1: i32) -> (i32, i32) {
    %c0_i32 = arith.constant 0 : i32
    %c0_i32_0 = arith.constant 0 : i32
    return %arg1, %c0_i32 : i32, i32
  }
  func.func @transform_3(%arg0: i32, %arg1: i32) -> (i32, i32) {
    %c0_i32 = arith.constant 0 : i32
    %c0_i32_0 = arith.constant 0 : i32
    return %arg0, %c0_i32 : i32, i32
  }
}

</mosaic_0001>

<bundles_post_ra>
// kernel: tpu_custom_call.1
= control target key start
LH: loop header
LB: loop body
LE: loop exit
PB: predicated region body
PF: predicated region fallthrough
CT: control target
= control target key end

     0   :  { %8 = vsyncpa [#allocation4], 0  ;;  %s1286_s0 = inlined_call_operand.hbm [shape: bf16[16,128], index: 0, kind: input, shape index: {}]   ;;  %s1287_s1 = inlined_call_operand.hbm [shape: bf16[128,768], index: 1, kind: input, shape index: {}]   ;;  %s1288_s2 = inlined_call_operand.hbm [shape: bf16[384,128], index: 2, kind: input, shape index: {}]   ;;  %s1289_s3 = inlined_call_operand.hbm [shape: f32[16,128], index: 3, kind: output, shape index: {}]  }
   0x1   :  { %9 = vsyncpa [#allocation7], 0 }
   0x2   :  { %10 = vsyncpa [#allocation5], 0  ;;  %s1202_s12 = smov [#allocation6]   ;;  %s1108_s16 = scalar_lea.hbm %s1287_s1, 6144 }
   0x3   :  { %s28_s13 = sshll.u32 %s1202_s12, 4  ;;  %p1109_p0 = scmp.ne.s32.totalorder %s1287_s1, %s1108_s16  ;;  %s29_s13 = int_to_ptr.vmem [resolvable:$true] %s28_s13 }
   0x4   :  { %p1112_p1 = scmp.lt.u32.totalorder %s1108_s16, %s1287_s1 }
   0x6   :  { %p1114_p2 = pnand %p1112_p1, %p1109_p0 }
   0x8   :  { %1117 = shalt.err (!%p1114_p2)
}
   0x9   :  { %s1118_s21 = scalar_lea.vmem %s29_s13, 6144  ;;  %p1123_p4 = scmp.lt.s32.totalorder %s29_s13, %s29_s13 }
   0xa   :  { %p1119_p3 = scmp.ne.s32.totalorder %s29_s13, %s1118_s21  ;;  %p1124_p5 = scmp.lt.s32.totalorder %s1118_s21, %s1118_s21 }
   0xc   :  { %p1125_p6 = por %p1124_p5, %p1123_p4 }
   0xe   :  { %p1126_p7 = pnand %p1125_p6, %p1119_p3 }
  0x10   :  { %1129 = shalt.err (!%p1126_p7)
}
  0x11   :  { %s1203_s22 = smov 384   ;;  %s1204_s23 = smov 24  }
  0x12   :  { %34 = dma.hbm_to_vmem [thread:$0]  %s1287_s1, 6144, %s29_s13, [#allocation7], %s1203_s22, %s1203_s22, %s1204_s23  }
  0x13   :  { %s1205_s26 = smov [#allocation3]   ;;  %s1130_s30 = scalar_lea.hbm %s1286_s0, 128 }
  0x14   :  { %s16_s27 = sshll.u32 %s1205_s26, 4  ;;  %p1131_p8 = scmp.ne.s32.totalorder %s1286_s0, %s1130_s30  ;;  %s17_s27 = int_to_ptr.vmem [resolvable:$true] %s16_s27 }
  0x15   :  { %p1134_p9 = scmp.lt.u32.totalorder %s1130_s30, %s1286_s0 }
  0x17   :  { %p1136_p10 = pnand %p1134_p9, %p1131_p8 }
  0x19   :  { %1139 = shalt.err (!%p1136_p10)
}
  0x1a   :  { %s1140_s8 = scalar_lea.vmem %s17_s27, 128  ;;  %p1145_p12 = scmp.lt.s32.totalorder %s17_s27, %s17_s27 }
  0x1b   :  { %p1141_p11 = scmp.ne.s32.totalorder %s17_s27, %s1140_s8  ;;  %p1146_p13 = scmp.lt.s32.totalorder %s1140_s8, %s1140_s8 }
  0x1d   :  { %p1147_p0 = por %p1146_p13, %p1145_p12 }
  0x1f   :  { %p1148_p1 = pnand %p1147_p0, %p1141_p11 }
  0x21   :  { %1151 = shalt.err (!%p1148_p1)
}
  0x22   :  { %s1206_s1 = smov 64   ;;  %s1207_s9 = smov 4  }
  0x23   :  { %22 = dma.hbm_to_vmem [thread:$0]  %s1286_s0, 128, %s17_s27, [#allocation4], %s1206_s1, %s1206_s1, %s1207_s9  }
  0x24   :  { %s1208_s12 = smov [#allocation8]   ;;  %s1152_s16 = scalar_lea.hbm %s1288_s2, 3072 }
  0x25   :  { %s40_s13 = sshll.u32 %s1208_s12, 4  ;;  %p1153_p2 = scmp.ne.s32.totalorder %s1288_s2, %s1152_s16  ;;  %s41_s13 = int_to_ptr.vmem [resolvable:$true] %s40_s13 }
  0x26   :  { %p1156_p3 = scmp.lt.u32.totalorder %s1152_s16, %s1288_s2 }
  0x28   :  { %p1158_p4 = pnand %p1156_p3, %p1153_p2 }
  0x2a   :  { %1161 = shalt.err (!%p1158_p4)
}
  0x2b   :  { %s1162_s21 = scalar_lea.vmem %s41_s13, 3072  ;;  %p1167_p6 = scmp.lt.s32.totalorder %s41_s13, %s41_s13 }
  0x2c   :  { %p1163_p5 = scmp.ne.s32.totalorder %s41_s13, %s1162_s21  ;;  %p1168_p7 = scmp.lt.s32.totalorder %s1162_s21, %s1162_s21 }
  0x2e   :  { %p1169_p8 = por %p1168_p7, %p1167_p6 }
  0x30   :  { %p1170_p9 = pnand %p1169_p8, %p1163_p5 }
  0x32   :  { %1173 = shalt.err (!%p1170_p9)
}
  0x33   :  { %46 = dma.hbm_to_vmem [thread:$0]  %s1288_s2, 3072, %s41_s13, [#allocation7], %s1206_s1, %s1206_s1, %s1207_s9  }
  0x34   :  { %1196 = dma.done.wait [#allocation4], 128  }
  0x35   :  { %1197 = vsyncadd [#allocation4], 4294967168 }
  0x36   :  { %1198 = dma.done.wait [#allocation7], 9216  }
  0x37   :  { %1199 = vsyncadd [#allocation7], 4294958080  ;;  %v1209_v0 = vmov 0   ;;  %v987_v1 = vld [vmem:[#allocation6 + $0x4] ss:$24 sps:$4 sm:$0xff]   ;;  %v1210_v53 = vmov 0.0  }
  0x38   :  { %391 = vmatprep.mubr.bf16.mxu0 %v1209_v0  ;;  %434 = vmatprep.mubr.bf16.mxu1 %v1209_v0  ;;  %v989_v2 = vld [vmem:[#allocation6 + $0xc] ss:$24 sps:$4 sm:$0xff]   ;;  %v991_v3 = vld [vmem:[#allocation6] ss:$24 sps:$4 sm:$0xff]   ;;  %v995_v6 = vld [vmem:[#allocation6 + $0x3c] ss:$24 sps:$4 sm:$0xff]  }
  0x39   :  { %359 = vmatprep.subr.bf16.mxu0 %v987_v1  ;;  %v992_v4 = vld [vmem:[#allocation6 + $0x8] ss:$24 sps:$4 sm:$0xff]   ;;  %402 = vmatprep.subr.bf16.mxu1 %v989_v2  ;;  %v993_v5 = vld [vmem:[#allocation6 + $0x34] ss:$24 sps:$4 sm:$0xff]   ;;  %v998_v8 = vld [vmem:[#allocation6 + $0x38] ss:$24 sps:$4 sm:$0xff]  }
  0x3a   :  { %360 = vmatpush1.bf16.msra.mxu0 %v991_v3  ;;  %403 = vmatpush1.bf16.msra.mxu1 %v992_v4  ;;  %v997_v7 = vld [vmem:[#allocation6 + $0x30] ss:$24 sps:$4 sm:$0xff]   ;;  %v999_v9 = vld [vmem:[#allocation6 + $0x64] ss:$24 sps:$4 sm:$0xff]   ;;  %v1003_v11 = vld [vmem:[#allocation6 + $0x60] ss:$24 sps:$4 sm:$0xff]  }
  0x3b   :  { %361 = vmatprep.subr.bf16.mxu0 %v993_v5  ;;  %404 = vmatprep.subr.bf16.mxu1 %v995_v6  ;;  %v1001_v10 = vld [vmem:[#allocation6 + $0x6c] ss:$24 sps:$4 sm:$0xff]   ;;  %v1004_v12 = vld [vmem:[#allocation6 + $0x68] ss:$24 sps:$4 sm:$0xff]   ;;  %v1007_v14 = vld [vmem:[#allocation6 + $0x9c] ss:$24 sps:$4 sm:$0xff]  }
  0x3c   :  { %v1005_v13 = vld [vmem:[#allocation6 + $0x94] ss:$24 sps:$4 sm:$0xff]   ;;  %v1009_v15 = vld [vmem:[#allocation6 + $0x90] ss:$24 sps:$4 sm:$0xff]   ;;  %v1011_v17 = vld [vmem:[#allocation6 + $0xc4] ss:$24 sps:$4 sm:$0xff]  }
  0x3d   :  { %v1010_v16 = vld [vmem:[#allocation6 + $0x98] ss:$24 sps:$4 sm:$0xff]   ;;  %v1013_v18 = vld [vmem:[#allocation6 + $0xcc] ss:$24 sps:$4 sm:$0xff]   ;;  %v1016_v20 = vld [vmem:[#allocation6 + $0xc8] ss:$24 sps:$4 sm:$0xff]  }
  0x3e   :  { %362 = vmatpush1.bf16.msra.mxu0 %v997_v7  ;;  %405 = vmatpush1.bf16.msra.mxu1 %v998_v8  ;;  %v1015_v19 = vld [vmem:[#allocation6 + $0xc0] ss:$24 sps:$4 sm:$0xff]   ;;  %v1017_v21 = vld [vmem:[#allocation6 + $0xf4] ss:$24 sps:$4 sm:$0xff]   ;;  %v1021_v23 = vld [vmem:[#allocation6 + $0xf0] ss:$24 sps:$4 sm:$0xff]  }
  0x3f   :  { %363 = vmatprep.subr.bf16.mxu0 %v999_v9  ;;  %406 = vmatprep.subr.bf16.mxu1 %v1001_v10  ;;  %v1019_v22 = vld [vmem:[#allocation6 + $0xfc] ss:$24 sps:$4 sm:$0xff]   ;;  %v1022_v24 = vld [vmem:[#allocation6 + $0xf8] ss:$24 sps:$4 sm:$0xff]   ;;  %v1025_v26 = vld [vmem:[#allocation6 + $0x12c] ss:$24 sps:$4 sm:$0xff]  }
  0x40   :  { %v1023_v25 = vld [vmem:[#allocation6 + $0x124] ss:$24 sps:$4 sm:$0xff]   ;;  %v1027_v27 = vld [vmem:[#allocation6 + $0x120] ss:$24 sps:$4 sm:$0xff]   ;;  %v1029_v29 = vld [vmem:[#allocation6 + $0x154] ss:$24 sps:$4 sm:$0xff]  }
  0x41   :  { %v1028_v28 = vld [vmem:[#allocation6 + $0x128] ss:$24 sps:$4 sm:$0xff]   ;;  %v1031_v30 = vld [vmem:[#allocation6 + $0x15c] ss:$24 sps:$4 sm:$0xff]   ;;  %v1034_v32 = vld [vmem:[#allocation6 + $0x158] ss:$24 sps:$4 sm:$0xff]  }
  0x42   :  { %364 = vmatpush1.bf16.msra.mxu0 %v1003_v11  ;;  %407 = vmatpush1.bf16.msra.mxu1 %v1004_v12  ;;  %v1033_v31 = vld [vmem:[#allocation6 + $0x150] ss:$24 sps:$4 sm:$0xff]   ;;  %v1038_v33 = vld [vmem:[#allocation6 + $0x14] ss:$24 sps:$4 sm:$0xff]   ;;  %v1035_v34 = vld [vmem:[#allocation3] sm:$0xff]   ;;  %vm1211_vm0 = vmmov 0  }
  0x43   :  { %365 = vmatprep.subr.bf16.mxu0 %v1005_v13  ;;  %408 = vmatprep.subr.bf16.mxu1 %v1007_v14  ;;  %v1036_v35 = vld [vmem:[#allocation6 + $0x10] ss:$24 sps:$4 sm:$0xff]   ;;  %v1041_v36 = vld [vmem:[#allocation6 + $0x44] ss:$24 sps:$4 sm:$0xff]   ;;  %v1039_v37 = vld [vmem:[#allocation6 + $0x40] ss:$24 sps:$4 sm:$0xff]  }
  0x44   :  { %v1044_v38 = vld [vmem:[#allocation6 + $0x74] ss:$24 sps:$4 sm:$0xff]   ;;  %v1042_v39 = vld [vmem:[#allocation6 + $0x70] ss:$24 sps:$4 sm:$0xff]   ;;  %v1047_v40 = vld [vmem:[#allocation6 + $0xa4] ss:$24 sps:$4 sm:$0xff]  }
  0x45   :  { %v1045_v41 = vld [vmem:[#allocation6 + $0xa0] ss:$24 sps:$4 sm:$0xff]   ;;  %v1050_v42 = vld [vmem:[#allocation6 + $0xd4] ss:$24 sps:$4 sm:$0xff]   ;;  %v1048_v43 = vld [vmem:[#allocation6 + $0xd0] ss:$24 sps:$4 sm:$0xff]  }
  0x46   :  { %366 = vmatpush1.bf16.msra.mxu0 %v1009_v15  ;;  %409 = vmatpush1.bf16.msra.mxu1 %v1010_v16  ;;  %v1053_v44 = vld [vmem:[#allocation6 + $0x104] ss:$24 sps:$4 sm:$0xff]   ;;  %v1051_v45 = vld [vmem:[#allocation6 + $0x100] ss:$24 sps:$4 sm:$0xff]   ;;  %v1056_v46 = vld [vmem:[#allocation6 + $0x134] ss:$24 sps:$4 sm:$0xff]  }
  0x47   :  { %367 = vmatprep.subr.bf16.mxu0 %v1011_v17  ;;  %410 = vmatprep.subr.bf16.mxu1 %v1013_v18  ;;  %v1054_v47 = vld [vmem:[#allocation6 + $0x130] ss:$24 sps:$4 sm:$0xff]   ;;  %v1059_v48 = vld [vmem:[#allocation6 + $0x164] ss:$24 sps:$4 sm:$0xff]   ;;  %v1057_v49 = vld [vmem:[#allocation6 + $0x160] ss:$24 sps:$4 sm:$0xff]  }
  0x48   :  { %v1060_v50 = vld [vmem:[#allocation8 + $0x40] sm:$0xff]   ;;  %v1063_v54 = vld [vmem:[#allocation8 + $0x48] sm:$0xff]   ;;  %v1066_v57 = vld [vmem:[#allocation8 + $0x50] sm:$0xff]   ;;  %s1212_s2 = smov [#allocation9]  }
  0x49   :  { %v1061_v51 = vld [vmem:[#allocation8] sm:$0xff]   ;;  %v1064_v55 = vld [vmem:[#allocation8 + $0x8] sm:$0xff]   ;;  %v1067_v58 = vld [vmem:[#allocation8 + $0x10] sm:$0xff]   ;;  %s831_s23 = sshll.u32 %s1212_s2, 4  ;;  %s832_s23 = int_to_ptr.vmem [resolvable:$true] %s831_s23 }
  0x4a   :  { %368 = vmatpush1.bf16.msra.mxu0 %v1015_v19  ;;  %411 = vmatpush1.bf16.msra.mxu1 %v1016_v20  ;;  %v1062_v52 = vld [vmem:[#allocation8 + $0x80] sm:$0xff]   ;;  %v1065_v56 = vld [vmem:[#allocation8 + $0x88] sm:$0xff]   ;;  %v1068_v59 = vld [vmem:[#allocation8 + $0x90] sm:$0xff]   ;;  %s1174_s24 = scalar_lea.vmem %s832_s23, 256  ;;  %p1179_p11 = scmp.lt.s32.totalorder %s832_s23, %s832_s23 }
  0x4b   :  { %369 = vmatprep.subr.bf16.mxu0 %v1017_v21  ;;  %412 = vmatprep.subr.bf16.mxu1 %v1019_v22  ;;  %v1069_v60 = vld [vmem:[#allocation8 + $0x58] sm:$0xff]   ;;  %v1072_v63 = vld [vmem:[#allocation8 + $0x60] sm:$0xff]   ;;  %v1075_v2 = vld [vmem:[#allocation8 + $0x68] sm:$0xff]   ;;  %p1175_p10 = scmp.ne.s32.totalorder %s832_s23, %s1174_s24  ;;  %p1180_p12 = scmp.lt.s32.totalorder %s1174_s24, %s1174_s24 }
  0x4c   :  { %v1070_v61 = vld [vmem:[#allocation8 + $0x18] sm:$0xff]   ;;  %v1074_v1 = vld [vmem:[#allocation8 + $0xa0] sm:$0xff]   ;;  %v1076_v3 = vld [vmem:[#allocation8 + $0x28] sm:$0xff]  }
  0x4d   :  { %v1071_v62 = vld [vmem:[#allocation8 + $0x98] sm:$0xff]   ;;  %v1077_v4 = vld [vmem:[#allocation8 + $0xa8] sm:$0xff]   ;;  %v1078_v5 = vld [vmem:[#allocation8 + $0x70] sm:$0xff]   ;;  %p1181_p13 = por %p1180_p12, %p1179_p11 }
  0x4e   :  { %370 = vmatpush1.bf16.msra.mxu0 %v1021_v23  ;;  %413 = vmatpush1.bf16.msra.mxu1 %v1022_v24  ;;  %v1079_v6 = vld [vmem:[#allocation8 + $0x30] sm:$0xff]   ;;  %v1081_v8 = vld [vmem:[#allocation8 + $0x78] sm:$0xff]  }
  0x4f   :  { %371 = vmatprep.subr.bf16.mxu0 %v1023_v25  ;;  %414 = vmatprep.subr.bf16.mxu1 %v1025_v26  ;;  %v1080_v7 = vld [vmem:[#allocation8 + $0xb0] sm:$0xff]   ;;  %v1082_v9 = vld [vmem:[#allocation8 + $0x38] sm:$0xff]   ;;  %p1182_p0 = pnand %p1181_p13, %p1175_p10 }
  0x50   :  { %v1083_v10 = vld [vmem:[#allocation8 + $0xb8] sm:$0xff]  }
  0x52   :  { %372 = vmatpush1.bf16.msra.mxu0 %v1027_v27  ;;  %415 = vmatpush1.bf16.msra.mxu1 %v1028_v28 }
  0x53   :  { %373 = vmatprep.subr.bf16.mxu0 %v1029_v29  ;;  %416 = vmatprep.subr.bf16.mxu1 %v1031_v30 }
  0x56   :  { %374 = vmatpush1.bf16.msra.mxu0 %v1033_v31  ;;  %417 = vmatpush1.bf16.msra.mxu1 %v1034_v32 }
  0x57   :  { %445 = vmatprep.subr.bf16.mxu0 %v1038_v33  ;;  %923 = vmatprep.subr.bf16.mxu1 %v1060_v50 }
  0x59   :  { %392 = vmatmul.mubr.bf16.vlgmr.msra.gmra.mrb[0].mxu0 %v1035_v34  ;;  %435 = vmatmul.mubr.bf16.vlgmr.msra.gmra.mrb[0].mxu1 %v1035_v34 }
  0x5a   :  { %446 = vmatpush1.bf16.msra.mxu0 %v1036_v35  ;;  %477 = vmatprep.mubr.bf16.mxu0 %v1209_v0  ;;  %v1073_v0 = vld [vmem:[#allocation8 + $0x20] sm:$0xff]  }
  0x5b   :  { %447 = vmatprep.subr.bf16.mxu0 %v1041_v36  ;;  %924 = vmatpush3.bf16.msra.mxu1 %v1061_v51 }
  0x5c   :  { %925 = vmatprep.subr.bf16.mxu1 %v1063_v54 }
  0x5e   :  { %448 = vmatpush1.bf16.msra.mxu0 %v1039_v37 }
  0x5f   :  { %449 = vmatprep.subr.bf16.mxu0 %v1044_v38  ;;  %926 = vmatpush3.bf16.msra.mxu1 %v1064_v55 }
  0x60   :  { %927 = vmatprep.subr.bf16.mxu1 %v1066_v57 }
  0x62   :  { %450 = vmatpush1.bf16.msra.mxu0 %v1042_v39 }
  0x63   :  { %451 = vmatprep.subr.bf16.mxu0 %v1047_v40  ;;  %928 = vmatpush3.bf16.msra.mxu1 %v1067_v58 }
  0x64   :  { %929 = vmatprep.subr.bf16.mxu1 %v1069_v60 }
  0x66   :  { %452 = vmatpush1.bf16.msra.mxu0 %v1045_v41 }
  0x67   :  { %453 = vmatprep.subr.bf16.mxu0 %v1050_v42  ;;  %930 = vmatpush3.bf16.msra.mxu1 %v1070_v61 }
  0x68   :  { %931 = vmatprep.subr.bf16.mxu1 %v1072_v63 }
  0x6a   :  { %454 = vmatpush1.bf16.msra.mxu0 %v1048_v43 }
  0x6b   :  { %455 = vmatprep.subr.bf16.mxu0 %v1053_v44  ;;  %932 = vmatpush3.bf16.msra.mxu1 %v1073_v0 }
  0x6c   :  { %933 = vmatprep.subr.bf16.mxu1 %v1075_v2 }
  0x6e   :  { %456 = vmatpush1.bf16.msra.mxu0 %v1051_v45 }
  0x6f   :  { %457 = vmatprep.subr.bf16.mxu0 %v1056_v46  ;;  %934 = vmatpush3.bf16.msra.mxu1 %v1076_v3 }
  0x70   :  { %935 = vmatprep.subr.bf16.mxu1 %v1078_v5 }
  0x72   :  { %458 = vmatpush1.bf16.msra.mxu0 %v1054_v47 }
  0x73   :  { %459 = vmatprep.subr.bf16.mxu0 %v1059_v48  ;;  %936 = vmatpush3.bf16.msra.mxu1 %v1079_v6 }
  0x74   :  { %937 = vmatprep.subr.bf16.mxu1 %v1081_v8 }
  0x76   :  { %460 = vmatpush1.bf16.msra.mxu0 %v1057_v49 }
  0x77   :  { %954 = vmatprep.subr.bf16.mxu0 %v1210_v53  ;;  %938 = vmatpush3.bf16.msra.mxu1 %v1082_v9 }
  0x79   :  { %478 = vmatmul.mubr.bf16.vlgmr.msra.gmra.mrb[4].mxu0 %v1035_v34 }
  0x7a   :  { %955 = vmatpush3.bf16.msra.mxu0 %v1062_v52  ;;  %970 = vmatprep.mubr.msk.bf16.mxu0 %vm1211_vm0, %v1210_v53 }
  0x7b   :  { %956 = vmatprep.subr.bf16.mxu0 %v1210_v53 }
  0x7e   :  { %957 = vmatpush3.bf16.msra.mxu0 %v1065_v56 }
  0x7f   :  { %958 = vmatprep.subr.bf16.mxu0 %v1210_v53 }
  0x82   :  { %959 = vmatpush3.bf16.msra.mxu0 %v1068_v59 }
  0x83   :  { %960 = vmatprep.subr.bf16.mxu0 %v1210_v53 }
  0x86   :  { %961 = vmatpush3.bf16.msra.mxu0 %v1071_v62 }
  0x87   :  { %962 = vmatprep.subr.bf16.mxu0 %v1210_v53 }
  0x8a   :  { %963 = vmatpush3.bf16.msra.mxu0 %v1074_v1 }
  0x8b   :  { %964 = vmatprep.subr.bf16.mxu0 %v1210_v53 }
  0x8e   :  { %965 = vmatpush3.bf16.msra.mxu0 %v1077_v4 }
  0x8f   :  { %966 = vmatprep.subr.bf16.mxu0 %v1210_v53 }
  0x92   :  { %967 = vmatpush3.bf16.msra.mxu0 %v1080_v7 }
  0x93   :  { %968 = vmatprep.subr.bf16.mxu0 %v1210_v53 }
  0x96   :  { %969 = vmatpush3.bf16.msra.mxu0 %v1083_v10 }
 0x12c   :  { %v393_v11 = vpop.f32.mrb[0].mxu0  ;;  %v436_v12 = vpop.f32.mrb[0].mxu1 }
 0x12d   :  { %v893_v13 = vmul.f32 -1.442695, %v393_v11  ;;  %v895_v14 = vmul.f32 -1.442695, %v436_v12  ;;  %v395_v15 = vpop.f32.mrb[1].mxu0  ;;  %v438_v16 = vpop.f32.mrb[1].mxu1 }
 0x12e   :  { %v894_v17 = vmul.f32 -1.442695, %v395_v15  ;;  %v397_v18 = vpop.f32.mrb[2].mxu0  ;;  %v440_v19 = vpop.f32.mrb[2].mxu1 }
 0x12f   :  { %1084 = vpow2.f32 %v893_v13  ;;  %v896_v20 = vmul.f32 -1.442695, %v397_v18  ;;  %v898_v21 = vmul.f32 -1.442695, %v440_v19  ;;  %v399_v22 = vpop.f32.mrb[3].mxu0  ;;  %v442_v23 = vpop.f32.mrb[3].mxu1 }
 0x130   :  { %1086 = vpow2.f32 %v895_v14  ;;  %v897_v24 = vmul.f32 -1.442695, %v399_v22 }
 0x131   :  { %1088 = vpow2.f32 %v894_v17 }
 0x132   :  { %1090 = vpow2.f32 %v896_v20 }
 0x133   :  { %1092 = vpow2.f32 %v898_v21 }
 0x134   :  { %1094 = vpow2.f32 %v897_v24 }
 0x139   :  { %v1085_v25 = vpop.eup %1084 }
 0x13a   :  { %v1087_v26 = vpop.eup %1086  ;;  %v506_v27 = vadd.f32 1.0, %v1085_v25 }
 0x13b   :  { %v1089_v28 = vpop.eup %1088  ;;  %v508_v29 = vadd.f32 1.0, %v1087_v26 }
 0x13c   :  { %v1091_v30 = vpop.eup %1090  ;;  %1096 = vrcp.f32 %v506_v27  ;;  %v507_v31 = vadd.f32 1.0, %v1089_v28 }
 0x13d   :  { %v1093_v32 = vpop.eup %1092  ;;  %1098 = vrcp.f32 %v508_v29  ;;  %v509_v33 = vadd.f32 1.0, %v1091_v30 }
 0x13e   :  { %v1095_v34 = vpop.eup %1094  ;;  %1100 = vrcp.f32 %v507_v31  ;;  %v511_v35 = vadd.f32 1.0, %v1093_v32 }
 0x13f   :  { %1102 = vrcp.f32 %v509_v33  ;;  %v510_v36 = vadd.f32 1.0, %v1095_v34 }
 0x140   :  { %1104 = vrcp.f32 %v511_v35 }
 0x141   :  { %1106 = vrcp.f32 %v510_v36 }
 0x146   :  { %v1097_v37 = vpop.eup %1096 }
 0x147   :  { %v1099_v38 = vpop.eup %1098  ;;  %v524_v39 = vmul.f32 %v1097_v37, %v393_v11 }
 0x148   :  { %v1101_v40 = vpop.eup %1100  ;;  %v526_v47 = vmul.f32 %v1099_v38, %v436_v12 }
 0x149   :  { %v1103_v41 = vpop.eup %1102  ;;  %v530_v42 = vmul.f32 %v524_v39, %v438_v16  ;;  %v525_v46 = vmul.f32 %v1101_v40, %v395_v15 }
 0x14a   :  { %v1105_v43 = vpop.eup %1104  ;;  %v527_v44 = vmul.f32 %v1103_v41, %v397_v18 }
 0x14b   :  { %v1107_v45 = vpop.eup %1106  ;;  %v529_v53 = vmul.f32 %v1105_v43, %v440_v19 }
 0x14c   :  { %v533_v48 = vmul.f32 %v527_v44, %v442_v23  ;;  %v479_v49 = vpop.f32.mrb[4].mxu0  ;;  %v528_v50 = vmul.f32 %v1107_v45, %v399_v22 }
 0x14d   :  { %v531_v51 = vmul.f32 %v525_v46, %v479_v49  ;;  %v481_v52 = vpop.f32.mrb[5].mxu0 }
 0x14e   :  { %v538_v54 = vpack.c.bf16 %v533_v48, %v530_v42  ;;  %v532_v55 = vmul.f32 %v526_v47, %v481_v52  ;;  %v483_v56 = vpop.f32.mrb[6].mxu0 }
 0x14f   :  { %v534_v57 = vmul.f32 %v528_v50, %v483_v56  ;;  %v485_v58 = vpop.f32.mrb[7].mxu0 }
 0x150   :  { %v535_v59 = vmul.f32 %v529_v53, %v485_v58 }
 0x151   :  { %v539_v60 = vpack.c.bf16 %v534_v57, %v531_v51 }
 0x152   :  { %v540_v61 = vpack.c.bf16 %v535_v59, %v532_v55 }
 0x153   :  { %765 = vmatprep.mubr.bf16.mxu1 %v539_v60 }
 0x154   :  { %766 = vmatmul.mubr.bf16.vlgmr.msra.gmra.mrb[4].mxu1 %v538_v54  ;;  %971 = vmatmul.mubr.bf16.vlgmr.msra.gmra.mrb[8].mxu0 %v540_v61 }
 0x227   :  { %v939_v62 = vpop.f32.mrb[4].mxu1  ;;  %v808_v63 = vpop.f32.mrb[8].mxu0 }
 0x228   :  { %v940_v0 = vpop.f32.mrb[5].mxu1  ;;  %v972_v1 = vpop.f32.mrb[9].mxu0 }
 0x229   :  { %v941_v2 = vadd.f32 %v940_v0, %v939_v62  ;;  %v942_v3 = vpop.f32.mrb[6].mxu1  ;;  %v811_v4 = vpop.f32.mrb[10].mxu0 }
 0x22a   :  { %v943_v5 = vpop.f32.mrb[7].mxu1  ;;  %v973_v6 = vpop.f32.mrb[11].mxu0 }
 0x22b   :  { %v809_v7 = vadd.f32 %v941_v2, %v808_v63  ;;  %v944_v8 = vadd.f32 %v943_v5, %v942_v3 }
 0x22d   :  { %824 = vst [vmem:[#allocation9] sm:$0xff] %v809_v7  ;;  %v812_v9 = vadd.f32 %v944_v8, %v811_v4 }
 0x22f   :  { %825 = vst [vmem:[#allocation9 + $0x8] sm:$0xff] %v812_v9 }
 0x230   :  { %1185 = shalt.err (!%p1182_p0)
}
 0x231   :  { %s1186_s27 = scalar_lea.hbm %s1289_s3, 256 }
 0x232   :  { %p1187_p1 = scmp.ne.s32.totalorder %s1289_s3, %s1186_s27  ;;  %p1190_p2 = scmp.lt.u32.totalorder %s1186_s27, %s1289_s3 }
 0x234   :  { %p1192_p3 = pnand %p1190_p2, %p1187_p1 }
 0x236   :  { %1195 = shalt.err (!%p1192_p3)
}
 0x237   :  { %s1213_s5 = smov 128   ;;  %s1214_s6 = smov 8  }
 0x238   :  { %837 = dma.vmem_to_hbm [thread:$0]  %s832_s23, 256, %s1289_s3, [#allocation5], %s1213_s5, %s1213_s5, %s1214_s6  }
 0x239   :  { %1200 = dma.done.wait [#allocation5], 256  }
 0x23a   :  { %1201 = vsyncadd [#allocation5], 4294967040 }
 0x23b   :  { %841 = vsyncpa [#allocation4], 1 }
 0x23c   :  { %842 = vsyncpa [#allocation7], 1 }
 0x23d   :  { %843 = vsyncpa [#allocation5], 1 }

</bundles_post_ra>
